<compile_context>
chip_gen: v7x
topology: tpu7x:2x2x1
jax: 0.10.0
libtpu: 0.0.40
codegen_flags: <defaults>
</compile_context>

<pallas_src>
import jax
import jax.numpy as jnp
from jax.experimental import pallas as pl
from jax.experimental.pallas import tpu as pltpu

# ---- module hyper-parameters (from Agent.__init__) --------------------------
NUM_FILTER_OPTION = 3          # decoder output size
INPUT_SIZE = 3                 # output is fed back as input, so input size == 3
HIDDEN = 64                    # nn.LSTMCell hidden_size (default)
NUM_STEPS = 4                  # unrolled recurrent steps

# ---- padded kernel dims ------------------------------------------------------
B = 8                          # padded batch (valid: row 0)
IP = 128                       # padded input/output feature dim (valid: 0..2)
HP = 128                       # padded hidden dim per gate (valid: 0..63)
GP = 4 * HP                    # padded gate dim (i, f, g, o blocks of HP each)


def agent_kernel(x_ref, wih_ref, whhf_ref, bias0_ref, biasr_ref,
                 wdec_ref, bdec_ref, out_ref, h_all):
    """Full NUM_STEPS recurrence; one MXU matmul per step on the serial chain."""
    # Hoist parameter loads out of the unrolled loop (no CSE across iterations).
    bias0 = bias0_ref[...]                                 # (1, GP) step-0 bias
    biasr = biasr_ref[...]                                 # (1, GP) fused bias, t>=1
    whhf = whhf_ref[...]                                   # (HP, GP) fused recurrent W

    c = jnp.zeros((B, HP), jnp.float32)
    h = jnp.zeros((B, HP), jnp.float32)

    # step 0: h0 = c0 = 0  ->  gates = x @ W_ih^T + (b_ih + b_hh)
    gates = (jnp.dot(x_ref[...], wih_ref[...],
                     preferred_element_type=jnp.float32) + bias0)

    for step in range(NUM_STEPS):                          # static unroll
        if step > 0:
            # decoder folded in: single matmul per recurrent step
            gates = jnp.dot(h, whhf, preferred_element_type=jnp.float32) + biasr
        i_g = jax.nn.sigmoid(gates[:, 0 * HP:1 * HP])      # 128-lane aligned slices
        f_g = jax.nn.sigmoid(gates[:, 1 * HP:2 * HP])
        g_g = jnp.tanh(gates[:, 2 * HP:3 * HP])
        o_g = jax.nn.sigmoid(gates[:, 3 * HP:4 * HP])
        c = f_g * c + i_g * g_g
        h = o_g * jnp.tanh(c)
        h_all[step * B:(step + 1) * B, :] = h              # stash, decode later

    # decoder, once, for all steps (off the serial critical path):
    # (NUM_STEPS*B, HP) @ (HP, IP) + b_dec
    out_ref[...] = (jnp.dot(h_all[...], wdec_ref[...],
                            preferred_element_type=jnp.float32)
                    + bdec_ref[...])


# ---- one-time host-side parameter preparation --------------------------------
def _pad_gate_blocks(m, rows_pad):
    """m: (rows, 4*HIDDEN) -> (rows_pad, GP); each gate block padded 64 -> HP lanes."""
    rows = m.shape[0]
    blocks = [jnp.pad(m[:, k * HIDDEN:(k + 1) * HIDDEN],
                      ((0, rows_pad - rows), (0, HP - HIDDEN)))
              for k in range(4)]
    return jnp.concatenate(blocks, axis=1)


def prepare_params(params):
    """Transpose, fuse the decoder into the recurrence, pre-add biases, pad.

    Run once per parameter set; the result is what agent_forward consumes.
    """
    w_ih, w_hh, b_ih, b_hh, w_dec, b_dec = params
    w_ih_t = w_ih.T                                        # (INPUT_SIZE, 4H)
    w_hh_t = w_hh.T                                        # (HIDDEN, 4H)
    w_dec_t = w_dec.T                                      # (HIDDEN, 3)

    # inp_{t+1} = h_t @ W_dec^T + b_dec  =>  fold decoder into recurrent weights:
    w_hh_fused = w_hh_t + w_dec_t @ w_ih_t                 # (HIDDEN, 4H)
    bias0 = (b_ih + b_hh)[None, :]                         # (1, 4H)   step 0
    bias_r = bias0 + (b_dec @ w_ih_t)[None, :]             # (1, 4H)   steps >= 1

    wih_p = _pad_gate_blocks(w_ih_t, IP)                   # (IP, GP)
    whhf_p = _pad_gate_blocks(w_hh_fused, HP)              # (HP, GP)
    bias0_p = _pad_gate_blocks(bias0, 1)                   # (1, GP)
    biasr_p = _pad_gate_blocks(bias_r, 1)                  # (1, GP)
    wdec_p = jnp.pad(w_dec_t, ((0, HP - HIDDEN), (0, IP - NUM_FILTER_OPTION)))
    bdec_p = jnp.pad(b_dec[None, :], ((0, 0), (0, IP - NUM_FILTER_OPTION)))
    return (wih_p, whhf_p, bias0_p, biasr_p, wdec_p, bdec_p)


@jax.jit
def agent_forward(x, prepped):
    """x: (1, INPUT_SIZE) f32 -> (NUM_STEPS, NUM_FILTER_OPTION) f32."""
    wih_p, whhf_p, bias0_p, biasr_p, wdec_p, bdec_p = prepped
    x_p = jnp.zeros((B, IP), jnp.float32).at[0, :INPUT_SIZE].set(x[0])

    vmem = pl.BlockSpec(memory_space=pltpu.MemorySpace.VMEM)
    out_padded = pl.pallas_call(
        agent_kernel,
        out_shape=jax.ShapeDtypeStruct((NUM_STEPS * B, IP), jnp.float32),
        in_specs=[vmem] * 7,
        out_specs=vmem,
        scratch_shapes=[pltpu.VMEM((NUM_STEPS * B, HP), jnp.float32)],
    )(x_p, wih_p, whhf_p, bias0_p, biasr_p, wdec_p, bdec_p)

    # torch.stack(outputs).squeeze(1) -> (num_steps, num_filter_option)
    return out_padded.reshape(NUM_STEPS, B, IP)[:, 0, :NUM_FILTER_OPTION]


# ---- pure-JAX reference replicating torch.nn.LSTMCell + Linear ----------------
def agent_forward_ref(x, params):
    w_ih, w_hh, b_ih, b_hh, w_dec, b_dec = params
    h = jnp.zeros((1, HIDDEN), jnp.float32)
    c = jnp.zeros((1, HIDDEN), jnp.float32)
    inp = x
    outs = []
    for _ in range(NUM_STEPS):
        gates = inp @ w_ih.T + b_ih + h @ w_hh.T + b_hh
        i_g = jax.nn.sigmoid(gates[:, 0 * HIDDEN:1 * HIDDEN])
        f_g = jax.nn.sigmoid(gates[:, 1 * HIDDEN:2 * HIDDEN])
        g_g = jnp.tanh(gates[:, 2 * HIDDEN:3 * HIDDEN])
        o_g = jax.nn.sigmoid(gates[:, 3 * HIDDEN:4 * HIDDEN])
        c = f_g * c + i_g * g_g
        h = o_g * jnp.tanh(c)
        out = h @ w_dec.T + b_dec
        outs.append(out)
        inp = out
    return jnp.concatenate(outs, axis=0)


def init_params(key):
    """Deterministic init mimicking PyTorch's uniform(-1/sqrt(H), 1/sqrt(H))."""
    k = 1.0 / jnp.sqrt(jnp.float32(HIDDEN))
    keys = jax.random.split(key, 6)
    u = lambda kk, shape: jax.random.uniform(kk, shape, jnp.float32, -k, k)
    w_ih = u(keys[0], (4 * HIDDEN, INPUT_SIZE))
    w_hh = u(keys[1], (4 * HIDDEN, HIDDEN))
    b_ih = u(keys[2], (4 * HIDDEN,))
    b_hh = u(keys[3], (4 * HIDDEN,))
    w_dec = u(keys[4], (NUM_FILTER_OPTION, HIDDEN))
    b_dec = u(keys[5], (NUM_FILTER_OPTION,))
    return (w_ih, w_hh, b_ih, b_hh, w_dec, b_dec)


if __name__ == "__main__":
    key = jax.random.PRNGKey(0)
    pkey, xkey = jax.random.split(key)
    params = init_params(pkey)
    x = jax.random.normal(xkey, (1, INPUT_SIZE), jnp.float32)

    # One-time prep (padding / transposition / decoder fold) -- not per call.
    prepped = jax.block_until_ready(prepare_params(params))

    out = jax.block_until_ready(agent_forward(x, prepped))
    ref = jax.block_until_ready(agent_forward_ref(x, params))

    assert out.shape == (NUM_STEPS, NUM_FILTER_OPTION), out.shape
    assert jnp.allclose(out, ref, rtol=1e-4, atol=1e-4), (out, ref)
    print("KERNEL_OK")
</pallas_src>

<mosaic_0001>
module attributes {stable_mosaic.version = 11 : i64} {
  func.func @agent_kernel(%arg0: memref<8x128xf32, #tpu.memory_space<vmem>>, %arg1: memref<128x512xf32, #tpu.memory_space<vmem>>, %arg2: memref<128x512xf32, #tpu.memory_space<vmem>>, %arg3: memref<1x512xf32, #tpu.memory_space<vmem>>, %arg4: memref<1x512xf32, #tpu.memory_space<vmem>>, %arg5: memref<128x128xf32, #tpu.memory_space<vmem>>, %arg6: memref<1x128xf32, #tpu.memory_space<vmem>>, %arg7: memref<32x128xf32, #tpu.memory_space<vmem>>, %arg8: memref<32x128xf32, #tpu.memory_space<vmem>>) attributes {dimension_semantics = [], scalar_prefetch = 0 : i64, scratch_operands = 1 : i64, tpu.core_type = #tpu.core_type<tc>} {
    %c0 = arith.constant 0 : index
    %c0_0 = arith.constant 0 : index
    %0 = vector.load %arg3[%c0, %c0_0] : memref<1x512xf32, #tpu.memory_space<vmem>>, vector<1x512xf32>
    %c0_1 = arith.constant 0 : index
    %c0_2 = arith.constant 0 : index
    %1 = vector.load %arg4[%c0_1, %c0_2] : memref<1x512xf32, #tpu.memory_space<vmem>>, vector<1x512xf32>
    %c0_3 = arith.constant 0 : index
    %c0_4 = arith.constant 0 : index
    %2 = vector.load %arg2[%c0_3, %c0_4] : memref<128x512xf32, #tpu.memory_space<vmem>>, vector<128x512xf32>
    %cst = arith.constant 0.000000e+00 : f32
    %3 = vector.broadcast %cst : f32 to vector<8x128xf32>
    %c0_5 = arith.constant 0 : index
    %c0_6 = arith.constant 0 : index
    %4 = vector.load %arg0[%c0_5, %c0_6] : memref<8x128xf32, #tpu.memory_space<vmem>>, vector<8x128xf32>
    %c0_7 = arith.constant 0 : index
    %c0_8 = arith.constant 0 : index
    %5 = vector.load %arg1[%c0_7, %c0_8] : memref<128x512xf32, #tpu.memory_space<vmem>>, vector<128x512xf32>
    %cst_9 = arith.constant dense<0.000000e+00> : vector<8x512xf32>
    %6 = tpu.matmul %4, %5, %cst_9 {dimension_numbers = #tpu.dot_dimension_numbers<[1], [0], [0], [1], [0, 0, 1, 1], [], []>} : vector<8x128xf32>, vector<128x512xf32>, vector<8x512xf32> -> vector<8x512xf32>
    %7 = vector.broadcast %0 : vector<1x512xf32> to vector<8x512xf32>
    %8 = arith.addf %6, %7 : vector<8x512xf32>
    %9 = vector.extract_strided_slice %8 {offsets = [0, 0], sizes = [8, 128], strides = [1, 1]} : vector<8x512xf32> to vector<8x128xf32>
    %10 = arith.negf %9 : vector<8x128xf32>
    %11 = math.exp %10 : vector<8x128xf32>
    %cst_10 = arith.constant 1.000000e+00 : f32
    %12 = vector.broadcast %cst_10 : f32 to vector<8x128xf32>
    %13 = arith.addf %12, %11 : vector<8x128xf32>
    %14 = arith.divf %12, %13 : vector<8x128xf32>
    %15 = vector.extract_strided_slice %8 {offsets = [0, 128], sizes = [8, 128], strides = [1, 1]} : vector<8x512xf32> to vector<8x128xf32>
    %16 = arith.negf %15 : vector<8x128xf32>
    %17 = math.exp %16 : vector<8x128xf32>
    %cst_11 = arith.constant 1.000000e+00 : f32
    %18 = vector.broadcast %cst_11 : f32 to vector<8x128xf32>
    %19 = arith.addf %18, %17 : vector<8x128xf32>
    %20 = arith.divf %18, %19 : vector<8x128xf32>
    %21 = vector.extract_strided_slice %8 {offsets = [0, 256], sizes = [8, 128], strides = [1, 1]} : vector<8x512xf32> to vector<8x128xf32>
    %22 = math.tanh %21 : vector<8x128xf32>
    %23 = vector.extract_strided_slice %8 {offsets = [0, 384], sizes = [8, 128], strides = [1, 1]} : vector<8x512xf32> to vector<8x128xf32>
    %24 = arith.negf %23 : vector<8x128xf32>
    %25 = math.exp %24 : vector<8x128xf32>
    %cst_12 = arith.constant 1.000000e+00 : f32
    %26 = vector.broadcast %cst_12 : f32 to vector<8x128xf32>
    %27 = arith.addf %26, %25 : vector<8x128xf32>
    %28 = arith.divf %26, %27 : vector<8x128xf32>
    %29 = arith.mulf %20, %3 : vector<8x128xf32>
    %30 = arith.mulf %14, %22 : vector<8x128xf32>
    %31 = arith.addf %29, %30 : vector<8x128xf32>
    %32 = math.tanh %31 : vector<8x128xf32>
    %33 = arith.mulf %28, %32 : vector<8x128xf32>
    %c0_13 = arith.constant 0 : index
    %c0_14 = arith.constant 0 : index
    %34 = vector.load %arg8[%c0_13, %c0_14] : memref<32x128xf32, #tpu.memory_space<vmem>>, vector<8x128xf32>
    tpu.vector_store %arg8[%c0_13, %c0_14], %33 {strides = array<i32>} : memref<32x128xf32, #tpu.memory_space<vmem>>, vector<8x128xf32>,
    %cst_15 = arith.constant dense<0.000000e+00> : vector<8x512xf32>
    %35 = tpu.matmul %33, %2, %cst_15 {dimension_numbers = #tpu.dot_dimension_numbers<[1], [0], [0], [1], [0, 0, 1, 1], [], []>} : vector<8x128xf32>, vector<128x512xf32>, vector<8x512xf32> -> vector<8x512xf32>
    %36 = vector.broadcast %1 : vector<1x512xf32> to vector<8x512xf32>
    %37 = arith.addf %35, %36 : vector<8x512xf32>
    %38 = vector.extract_strided_slice %37 {offsets = [0, 0], sizes = [8, 128], strides = [1, 1]} : vector<8x512xf32> to vector<8x128xf32>
    %39 = arith.negf %38 : vector<8x128xf32>
    %40 = math.exp %39 : vector<8x128xf32>
    %cst_16 = arith.constant 1.000000e+00 : f32
    %41 = vector.broadcast %cst_16 : f32 to vector<8x128xf32>
    %42 = arith.addf %41, %40 : vector<8x128xf32>
    %43 = arith.divf %41, %42 : vector<8x128xf32>
    %44 = vector.extract_strided_slice %37 {offsets = [0, 128], sizes = [8, 128], strides = [1, 1]} : vector<8x512xf32> to vector<8x128xf32>
    %45 = arith.negf %44 : vector<8x128xf32>
    %46 = math.exp %45 : vector<8x128xf32>
    %cst_17 = arith.constant 1.000000e+00 : f32
    %47 = vector.broadcast %cst_17 : f32 to vector<8x128xf32>
    %48 = arith.addf %47, %46 : vector<8x128xf32>
    %49 = arith.divf %47, %48 : vector<8x128xf32>
    %50 = vector.extract_strided_slice %37 {offsets = [0, 256], sizes = [8, 128], strides = [1, 1]} : vector<8x512xf32> to vector<8x128xf32>
    %51 = math.tanh %50 : vector<8x128xf32>
    %52 = vector.extract_strided_slice %37 {offsets = [0, 384], sizes = [8, 128], strides = [1, 1]} : vector<8x512xf32> to vector<8x128xf32>
    %53 = arith.negf %52 : vector<8x128xf32>
    %54 = math.exp %53 : vector<8x128xf32>
    %cst_18 = arith.constant 1.000000e+00 : f32
    %55 = vector.broadcast %cst_18 : f32 to vector<8x128xf32>
    %56 = arith.addf %55, %54 : vector<8x128xf32>
    %57 = arith.divf %55, %56 : vector<8x128xf32>
    %58 = arith.mulf %49, %31 : vector<8x128xf32>
    %59 = arith.mulf %43, %51 : vector<8x128xf32>
    %60 = arith.addf %58, %59 : vector<8x128xf32>
    %61 = math.tanh %60 : vector<8x128xf32>
    %62 = arith.mulf %57, %61 : vector<8x128xf32>
    %c8 = arith.constant 8 : index
    %c0_19 = arith.constant 0 : index
    %63 = vector.load %arg8[%c8, %c0_19] : memref<32x128xf32, #tpu.memory_space<vmem>>, vector<8x128xf32>
    tpu.vector_store %arg8[%c8, %c0_19], %62 {strides = array<i32>} : memref<32x128xf32, #tpu.memory_space<vmem>>, vector<8x128xf32>,
    %cst_20 = arith.constant dense<0.000000e+00> : vector<8x512xf32>
    %64 = tpu.matmul %62, %2, %cst_20 {dimension_numbers = #tpu.dot_dimension_numbers<[1], [0], [0], [1], [0, 0, 1, 1], [], []>} : vector<8x128xf32>, vector<128x512xf32>, vector<8x512xf32> -> vector<8x512xf32>
    %65 = vector.broadcast %1 : vector<1x512xf32> to vector<8x512xf32>
    %66 = arith.addf %64, %65 : vector<8x512xf32>
    %67 = vector.extract_strided_slice %66 {offsets = [0, 0], sizes = [8, 128], strides = [1, 1]} : vector<8x512xf32> to vector<8x128xf32>
    %68 = arith.negf %67 : vector<8x128xf32>
    %69 = math.exp %68 : vector<8x128xf32>
    %cst_21 = arith.constant 1.000000e+00 : f32
    %70 = vector.broadcast %cst_21 : f32 to vector<8x128xf32>
    %71 = arith.addf %70, %69 : vector<8x128xf32>
    %72 = arith.divf %70, %71 : vector<8x128xf32>
    %73 = vector.extract_strided_slice %66 {offsets = [0, 128], sizes = [8, 128], strides = [1, 1]} : vector<8x512xf32> to vector<8x128xf32>
    %74 = arith.negf %73 : vector<8x128xf32>
    %75 = math.exp %74 : vector<8x128xf32>
    %cst_22 = arith.constant 1.000000e+00 : f32
    %76 = vector.broadcast %cst_22 : f32 to vector<8x128xf32>
    %77 = arith.addf %76, %75 : vector<8x128xf32>
    %78 = arith.divf %76, %77 : vector<8x128xf32>
    %79 = vector.extract_strided_slice %66 {offsets = [0, 256], sizes = [8, 128], strides = [1, 1]} : vector<8x512xf32> to vector<8x128xf32>
    %80 = math.tanh %79 : vector<8x128xf32>
    %81 = vector.extract_strided_slice %66 {offsets = [0, 384], sizes = [8, 128], strides = [1, 1]} : vector<8x512xf32> to vector<8x128xf32>
    %82 = arith.negf %81 : vector<8x128xf32>
    %83 = math.exp %82 : vector<8x128xf32>
    %cst_23 = arith.constant 1.000000e+00 : f32
    %84 = vector.broadcast %cst_23 : f32 to vector<8x128xf32>
    %85 = arith.addf %84, %83 : vector<8x128xf32>
    %86 = arith.divf %84, %85 : vector<8x128xf32>
    %87 = arith.mulf %78, %60 : vector<8x128xf32>
    %88 = arith.mulf %72, %80 : vector<8x128xf32>
    %89 = arith.addf %87, %88 : vector<8x128xf32>
    %90 = math.tanh %89 : vector<8x128xf32>
    %91 = arith.mulf %86, %90 : vector<8x128xf32>
    %c16 = arith.constant 16 : index
    %c0_24 = arith.constant 0 : index
    %92 = vector.load %arg8[%c16, %c0_24] : memref<32x128xf32, #tpu.memory_space<vmem>>, vector<8x128xf32>
    tpu.vector_store %arg8[%c16, %c0_24], %91 {strides = array<i32>} : memref<32x128xf32, #tpu.memory_space<vmem>>, vector<8x128xf32>,
    %cst_25 = arith.constant dense<0.000000e+00> : vector<8x512xf32>
    %93 = tpu.matmul %91, %2, %cst_25 {dimension_numbers = #tpu.dot_dimension_numbers<[1], [0], [0], [1], [0, 0, 1, 1], [], []>} : vector<8x128xf32>, vector<128x512xf32>, vector<8x512xf32> -> vector<8x512xf32>
    %94 = vector.broadcast %1 : vector<1x512xf32> to vector<8x512xf32>
    %95 = arith.addf %93, %94 : vector<8x512xf32>
    %96 = vector.extract_strided_slice %95 {offsets = [0, 0], sizes = [8, 128], strides = [1, 1]} : vector<8x512xf32> to vector<8x128xf32>
    %97 = arith.negf %96 : vector<8x128xf32>
    %98 = math.exp %97 : vector<8x128xf32>
    %cst_26 = arith.constant 1.000000e+00 : f32
    %99 = vector.broadcast %cst_26 : f32 to vector<8x128xf32>
    %100 = arith.addf %99, %98 : vector<8x128xf32>
    %101 = arith.divf %99, %100 : vector<8x128xf32>
    %102 = vector.extract_strided_slice %95 {offsets = [0, 128], sizes = [8, 128], strides = [1, 1]} : vector<8x512xf32> to vector<8x128xf32>
    %103 = arith.negf %102 : vector<8x128xf32>
    %104 = math.exp %103 : vector<8x128xf32>
    %cst_27 = arith.constant 1.000000e+00 : f32
    %105 = vector.broadcast %cst_27 : f32 to vector<8x128xf32>
    %106 = arith.addf %105, %104 : vector<8x128xf32>
    %107 = arith.divf %105, %106 : vector<8x128xf32>
    %108 = vector.extract_strided_slice %95 {offsets = [0, 256], sizes = [8, 128], strides = [1, 1]} : vector<8x512xf32> to vector<8x128xf32>
    %109 = math.tanh %108 : vector<8x128xf32>
    %110 = vector.extract_strided_slice %95 {offsets = [0, 384], sizes = [8, 128], strides = [1, 1]} : vector<8x512xf32> to vector<8x128xf32>
    %111 = arith.negf %110 : vector<8x128xf32>
    %112 = math.exp %111 : vector<8x128xf32>
    %cst_28 = arith.constant 1.000000e+00 : f32
    %113 = vector.broadcast %cst_28 : f32 to vector<8x128xf32>
    %114 = arith.addf %113, %112 : vector<8x128xf32>
    %115 = arith.divf %113, %114 : vector<8x128xf32>
    %116 = arith.mulf %107, %89 : vector<8x128xf32>
    %117 = arith.mulf %101, %109 : vector<8x128xf32>
    %118 = arith.addf %116, %117 : vector<8x128xf32>
    %119 = math.tanh %118 : vector<8x128xf32>
    %120 = arith.mulf %115, %119 : vector<8x128xf32>
    %c24 = arith.constant 24 : index
    %c0_29 = arith.constant 0 : index
    %121 = vector.load %arg8[%c24, %c0_29] : memref<32x128xf32, #tpu.memory_space<vmem>>, vector<8x128xf32>
    tpu.vector_store %arg8[%c24, %c0_29], %120 {strides = array<i32>} : memref<32x128xf32, #tpu.memory_space<vmem>>, vector<8x128xf32>,
    %c0_30 = arith.constant 0 : index
    %c0_31 = arith.constant 0 : index
    %122 = vector.load %arg8[%c0_30, %c0_31] : memref<32x128xf32, #tpu.memory_space<vmem>>, vector<32x128xf32>
    %c0_32 = arith.constant 0 : index
    %c0_33 = arith.constant 0 : index
    %123 = vector.load %arg5[%c0_32, %c0_33] : memref<128x128xf32, #tpu.memory_space<vmem>>, vector<128x128xf32>
    %cst_34 = arith.constant dense<0.000000e+00> : vector<32x128xf32>
    %124 = tpu.matmul %122, %123, %cst_34 {dimension_numbers = #tpu.dot_dimension_numbers<[1], [0], [0], [1], [0, 0, 1, 1], [], []>} : vector<32x128xf32>, vector<128x128xf32>, vector<32x128xf32> -> vector<32x128xf32>
    %c0_35 = arith.constant 0 : index
    %c0_36 = arith.constant 0 : index
    %125 = vector.load %arg6[%c0_35, %c0_36] : memref<1x128xf32, #tpu.memory_space<vmem>>, vector<1x128xf32>
    %126 = vector.broadcast %125 : vector<1x128xf32> to vector<32x128xf32>
    %127 = arith.addf %124, %126 : vector<32x128xf32>
    %c0_37 = arith.constant 0 : index
    %c0_38 = arith.constant 0 : index
    %128 = vector.load %arg7[%c0_37, %c0_38] : memref<32x128xf32, #tpu.memory_space<vmem>>, vector<32x128xf32>
    tpu.vector_store %arg7[%c0_37, %c0_38], %127 {strides = array<i32>} : memref<32x128xf32, #tpu.memory_space<vmem>>, vector<32x128xf32>,
    return
  }
}

</mosaic_0001>

<bundles_post_ra>
// kernel: agent_forward.1
= control target key start
LH: loop header
LB: loop body
LE: loop exit
PB: predicated region body
PF: predicated region fallthrough
CT: control target
= control target key end

     0   :  { %12 = vsyncpa [#allocation4], 0  ;;  %s1878_s0 = inlined_call_operand.vmem [shape: f32[8,128], index: 0, kind: input, shape index: {}]   ;;  %s1879_s1 = inlined_call_operand.hbm [shape: f32[128,512], index: 1, kind: input, shape index: {}]   ;;  %s1880_s2 = inlined_call_operand.hbm [shape: f32[128,512], index: 2, kind: input, shape index: {}]   ;;  %s1881_s3 = inlined_call_operand.vmem [shape: f32[1,512], index: 3, kind: input, shape index: {}]   ;;  %s1882_s4 = inlined_call_operand.vmem [shape: f32[1,512], index: 4, kind: input, shape index: {}]   ;;  %s1883_s5 = inlined_call_operand.hbm [shape: f32[128,128], index: 5, kind: input, shape index: {}]   ;;  %s1884_s6 = inlined_call_operand.vmem [shape: f32[1,128], index: 6, kind: input, shape index: {}]   ;;  %s1885_s7 = inlined_call_operand.vmem [shape: f32[32,128], index: 7, kind: output, shape index: {}]  }
   0x1   :  { %13 = vsyncpa [#allocation6], 0  ;;  %s1531_s24 = smov [#allocation5]   ;;  %s1532_s26 = smov [#allocation3]  }
   0x2   :  { %s33_s25 = sshll.u32 %s1531_s24, 4  ;;  %s21_s27 = sshll.u32 %s1532_s26, 4  ;;  %s34_s25 = int_to_ptr.vmem [resolvable:$true] %s33_s25  ;;  %s1579_s27 = int_to_ptr.vmem [resolvable:$true] %s21_s27 }
   0x3   :  { %s1461_s30 = scalar_lea.hbm %s1880_s2, 8192 }
   0x4   :  { %p1462_p0 = scmp.ne.s32.totalorder %s1880_s2, %s1461_s30  ;;  %p1465_p1 = scmp.lt.u32.totalorder %s1461_s30, %s1880_s2 }
   0x6   :  { %p1467_p2 = pnand %p1465_p1, %p1462_p0 }
   0x8   :  { %1470 = shalt.err (!%p1467_p2)
}
   0x9   :  { %s1471_s12 = scalar_lea.vmem %s34_s25, 8192  ;;  %p1476_p4 = scmp.lt.s32.totalorder %s34_s25, %s34_s25 }
   0xa   :  { %p1472_p3 = scmp.ne.s32.totalorder %s34_s25, %s1471_s12  ;;  %p1477_p5 = scmp.lt.s32.totalorder %s1471_s12, %s1471_s12 }
   0xc   :  { %p1478_p6 = por %p1477_p5, %p1476_p4 }
   0xe   :  { %p1479_p7 = pnand %p1478_p6, %p1472_p3 }
  0x10   :  { %1482 = shalt.err (!%p1479_p7)
}
  0x11   :  { %s1533_s13 = smov 512   ;;  %s1534_s14 = smov 32  }
  0x12   :  { %39 = dma.hbm_to_vmem [thread:$0]  %s1880_s2, 8192, %s34_s25, [#allocation6], %s1533_s13, %s1533_s13, %s1534_s14  }
  0x13   :  { %s1483_s19 = scalar_lea.hbm %s1879_s1, 8192 }
  0x14   :  { %p1484_p8 = scmp.ne.s32.totalorder %s1879_s1, %s1483_s19  ;;  %p1487_p9 = scmp.lt.u32.totalorder %s1483_s19, %s1879_s1 }
  0x16   :  { %p1489_p10 = pnand %p1487_p9, %p1484_p8 }
  0x18   :  { %1492 = shalt.err (!%p1489_p10)
}
  0x19   :  { %s1493_s24 = scalar_lea.vmem %s1579_s27, 8192  ;;  %p1498_p12 = scmp.lt.s32.totalorder %s1579_s27, %s1579_s27 }
  0x1a   :  { %p1494_p11 = scmp.ne.s32.totalorder %s1579_s27, %s1493_s24  ;;  %p1499_p13 = scmp.lt.s32.totalorder %s1493_s24, %s1493_s24 }
  0x1c   :  { %p1500_p0 = por %p1499_p13, %p1498_p12 }
  0x1e   :  { %p1501_p1 = pnand %p1500_p0, %p1494_p11 }
  0x20   :  { %1504 = shalt.err (!%p1501_p1)
}
  0x21   :  { %27 = dma.hbm_to_vmem [thread:$0]  %s1879_s1, 8192, %s1579_s27, [#allocation4], %s1533_s13, %s1533_s13, %s1534_s14  }
  0x22   :  { %s1535_s26 = smov [#allocation7]   ;;  %s1505_s8 = scalar_lea.hbm %s1883_s5, 2048 }
  0x23   :  { %s49_s28 = sshll.u32 %s1535_s26, 4  ;;  %p1506_p2 = scmp.ne.s32.totalorder %s1883_s5, %s1505_s8  ;;  %s50_s28 = int_to_ptr.vmem [resolvable:$true] %s49_s28 }
  0x24   :  { %p1509_p3 = scmp.lt.u32.totalorder %s1505_s8, %s1883_s5 }
  0x26   :  { %p1511_p4 = pnand %p1509_p3, %p1506_p2 }
  0x28   :  { %1514 = shalt.err (!%p1511_p4)
}
  0x29   :  { %s1515_s15 = scalar_lea.vmem %s50_s28, 2048  ;;  %p1520_p6 = scmp.lt.s32.totalorder %s50_s28, %s50_s28 }
  0x2a   :  { %p1516_p5 = scmp.ne.s32.totalorder %s50_s28, %s1515_s15  ;;  %p1521_p7 = scmp.lt.s32.totalorder %s1515_s15, %s1515_s15 }
  0x2c   :  { %p1522_p8 = por %p1521_p7, %p1520_p6 }
  0x2e   :  { %p1523_p9 = pnand %p1522_p8, %p1516_p5 }
  0x30   :  { %1526 = shalt.err (!%p1523_p9)
}
  0x31   :  { %s1536_s1 = smov 128   ;;  %s1537_s27 = smov 8  }
  0x32   :  { %55 = dma.hbm_to_vmem [thread:$0]  %s1883_s5, 2048, %s50_s28, [#allocation6], %s1536_s1, %s1536_s1, %s1537_s27  }
  0x33   :  { %1527 = dma.done.wait [#allocation4], 8192  }
  0x34   :  { %1528 = vsyncadd [#allocation4], 4294959104 }
  0x35   :  { %1529 = dma.done.wait [#allocation6], 10240  }
  0x36   :  { %1530 = vsyncadd [#allocation6], 4294957056  ;;  %v1538_v0 = vmov 0.0   ;;  %v135_v1 = vld [vmem:[#allocation3 + $0x8] sm:$0xff]  ;;  %v134_v3 = vld [vmem:[#allocation3] sm:$0xff] }
  0x37   :  { %283 = vmatprep.mubr.f32.mxu1 %v1538_v0  ;;  %471 = vmatprep.mubr.f32.mxu0 %v1538_v0  ;;  %v139_v2 = vld [vmem:[#allocation3 + $0x28] sm:$0xff]  ;;  %v138_v5 = vld [vmem:[#allocation3 + $0x20] sm:$0xff]  ;;  %v137_v48 = vld [vmem:[#allocation3 + $0x18] sm:$0xff] }
  0x38   :  { %v1101_v4 = vpack.c.bf16 %v139_v2, %v135_v1  ;;  %v143_v6 = vld [vmem:[#allocation3 + $0x48] sm:$0xff]  ;;  %v1103_v8 = vpack.c.bf16 %v138_v5, %v134_v3  ;;  %v142_v10 = vld [vmem:[#allocation3 + $0x40] sm:$0xff]  ;;  %v141_v49 = vld [vmem:[#allocation3 + $0x38] sm:$0xff] }
  0x39   :  { %v147_v7 = vld [vmem:[#allocation3 + $0x68] sm:$0xff]  ;;  %v146_v11 = vld [vmem:[#allocation3 + $0x60] sm:$0xff]  ;;  %v1133_v51 = vpack.c.bf16 %v141_v49, %v137_v48  ;;  %v136_v52 = vld [vmem:[#allocation3 + $0x10] sm:$0xff] }
  0x3a   :  { %v1105_v9 = vpack.c.bf16 %v147_v7, %v143_v6  ;;  %v151_v12 = vld [vmem:[#allocation3 + $0x88] sm:$0xff]  ;;  %1102 = vmatprep.subr.bf16.mxu1 %v1101_v4  ;;  %v1107_v14 = vpack.c.bf16 %v146_v11, %v142_v10  ;;  %v150_v16 = vld [vmem:[#allocation3 + $0x80] sm:$0xff]  ;;  %v140_v53 = vld [vmem:[#allocation3 + $0x30] sm:$0xff] }
  0x3b   :  { %v155_v13 = vld [vmem:[#allocation3 + $0xa8] sm:$0xff]  ;;  %1104 = vmatpush1.bf16.msra.mxu1 %v1103_v8  ;;  %v154_v17 = vld [vmem:[#allocation3 + $0xa0] sm:$0xff]  ;;  %v145_v54 = vld [vmem:[#allocation3 + $0x58] sm:$0xff]  ;;  %v1135_v57 = vpack.c.bf16 %v140_v53, %v136_v52 }
  0x3c   :  { %1106 = vmatprep.subr.bf16.mxu1 %v1105_v9  ;;  %v1109_v15 = vpack.c.bf16 %v155_v13, %v151_v12  ;;  %v159_v18 = vld [vmem:[#allocation3 + $0xc8] sm:$0xff]  ;;  %v1111_v20 = vpack.c.bf16 %v154_v17, %v150_v16  ;;  %v158_v22 = vld [vmem:[#allocation3 + $0xc0] sm:$0xff]  ;;  %v149_v55 = vld [vmem:[#allocation3 + $0x78] sm:$0xff] }
  0x3d   :  { %v163_v19 = vld [vmem:[#allocation3 + $0xe8] sm:$0xff]  ;;  %v162_v23 = vld [vmem:[#allocation3 + $0xe0] sm:$0xff]  ;;  %v1137_v58 = vpack.c.bf16 %v149_v55, %v145_v54  ;;  %v144_v59 = vld [vmem:[#allocation3 + $0x50] sm:$0xff] }
  0x3e   :  { %v1113_v21 = vpack.c.bf16 %v163_v19, %v159_v18  ;;  %v167_v24 = vld [vmem:[#allocation3 + $0x108] sm:$0xff]  ;;  %v1115_v26 = vpack.c.bf16 %v162_v23, %v158_v22  ;;  %v166_v28 = vld [vmem:[#allocation3 + $0x100] sm:$0xff]  ;;  %v148_v60 = vld [vmem:[#allocation3 + $0x70] sm:$0xff] }
  0x3f   :  { %1108 = vmatpush1.bf16.msra.mxu1 %v1107_v14  ;;  %v171_v25 = vld [vmem:[#allocation3 + $0x128] sm:$0xff]  ;;  %v170_v29 = vld [vmem:[#allocation3 + $0x120] sm:$0xff]  ;;  %v153_v61 = vld [vmem:[#allocation3 + $0x98] sm:$0xff]  ;;  %v1139_v63 = vpack.c.bf16 %v148_v60, %v144_v59 }
  0x40   :  { %1110 = vmatprep.subr.bf16.mxu1 %v1109_v15  ;;  %v1117_v27 = vpack.c.bf16 %v171_v25, %v167_v24  ;;  %v175_v30 = vld [vmem:[#allocation3 + $0x148] sm:$0xff]  ;;  %v1119_v32 = vpack.c.bf16 %v170_v29, %v166_v28  ;;  %v174_v34 = vld [vmem:[#allocation3 + $0x140] sm:$0xff]  ;;  %v157_v62 = vld [vmem:[#allocation3 + $0xb8] sm:$0xff] }
  0x41   :  { %v179_v31 = vld [vmem:[#allocation3 + $0x168] sm:$0xff]  ;;  %v178_v35 = vld [vmem:[#allocation3 + $0x160] sm:$0xff]  ;;  %v1141_v1 = vpack.c.bf16 %v157_v62, %v153_v61  ;;  %v152_v2 = vld [vmem:[#allocation3 + $0x90] sm:$0xff] }
  0x42   :  { %v1121_v33 = vpack.c.bf16 %v179_v31, %v175_v30  ;;  %v183_v36 = vld [vmem:[#allocation3 + $0x188] sm:$0xff]  ;;  %v1123_v38 = vpack.c.bf16 %v178_v35, %v174_v34  ;;  %v182_v40 = vld [vmem:[#allocation3 + $0x180] sm:$0xff]  ;;  %v156_v3 = vld [vmem:[#allocation3 + $0xb0] sm:$0xff] }
  0x43   :  { %1112 = vmatpush1.bf16.msra.mxu1 %v1111_v20  ;;  %v187_v37 = vld [vmem:[#allocation3 + $0x1a8] sm:$0xff]  ;;  %v186_v41 = vld [vmem:[#allocation3 + $0x1a0] sm:$0xff]  ;;  %v161_v4 = vld [vmem:[#allocation3 + $0xd8] sm:$0xff]  ;;  %v1143_v6 = vpack.c.bf16 %v156_v3, %v152_v2 }
  0x44   :  { %1114 = vmatprep.subr.bf16.mxu1 %v1113_v21  ;;  %v1125_v39 = vpack.c.bf16 %v187_v37, %v183_v36  ;;  %v191_v42 = vld [vmem:[#allocation3 + $0x1c8] sm:$0xff]  ;;  %v1127_v44 = vpack.c.bf16 %v186_v41, %v182_v40  ;;  %v190_v46 = vld [vmem:[#allocation3 + $0x1c0] sm:$0xff]  ;;  %v165_v5 = vld [vmem:[#allocation3 + $0xf8] sm:$0xff] }
  0x45   :  { %v195_v43 = vld [vmem:[#allocation3 + $0x1e8] sm:$0xff]  ;;  %v194_v47 = vld [vmem:[#allocation3 + $0x1e0] sm:$0xff]  ;;  %v1145_v7 = vpack.c.bf16 %v165_v5, %v161_v4  ;;  %v160_v8 = vld [vmem:[#allocation3 + $0xd0] sm:$0xff] }
  0x46   :  { %v1129_v45 = vpack.c.bf16 %v195_v43, %v191_v42  ;;  %v1131_v50 = vpack.c.bf16 %v194_v47, %v190_v46  ;;  %v133_v56 = vld [vmem:[%s1878_s0] sm:$0xff]  ;;  %v164_v9 = vld [vmem:[#allocation3 + $0xf0] sm:$0xff]  ;;  %v169_v10 = vld [vmem:[#allocation3 + $0x118] sm:$0xff] }
  0x47   :  { %1116 = vmatpush1.bf16.msra.mxu1 %v1115_v26  ;;  %v173_v11 = vld [vmem:[#allocation3 + $0x138] sm:$0xff]  ;;  %v1147_v12 = vpack.c.bf16 %v164_v9, %v160_v8  ;;  %v168_v14 = vld [vmem:[#allocation3 + $0x110] sm:$0xff]  ;;  %v70_v35 = vld [vmem:[#allocation5 + $0x8] sm:$0xff] }
  0x48   :  { %1118 = vmatprep.subr.bf16.mxu1 %v1117_v27  ;;  %v1149_v13 = vpack.c.bf16 %v173_v11, %v169_v10  ;;  %v172_v15 = vld [vmem:[#allocation3 + $0x130] sm:$0xff]  ;;  %v177_v16 = vld [vmem:[#allocation3 + $0x158] sm:$0xff]  ;;  %v74_v36 = vld [vmem:[#allocation5 + $0x28] sm:$0xff] }
  0x49   :  { %v181_v17 = vld [vmem:[#allocation3 + $0x178] sm:$0xff]  ;;  %v1151_v18 = vpack.c.bf16 %v172_v15, %v168_v14  ;;  %v176_v20 = vld [vmem:[#allocation3 + $0x150] sm:$0xff]  ;;  %v69_v40 = vld [vmem:[#allocation5] sm:$0xff] }
  0x4a   :  { %v1153_v19 = vpack.c.bf16 %v181_v17, %v177_v16  ;;  %v180_v21 = vld [vmem:[#allocation3 + $0x170] sm:$0xff]  ;;  %v185_v22 = vld [vmem:[#allocation3 + $0x198] sm:$0xff]  ;;  %v73_v41 = vld [vmem:[#allocation5 + $0x20] sm:$0xff] }
  0x4b   :  { %1120 = vmatpush1.bf16.msra.mxu1 %v1119_v32  ;;  %v189_v23 = vld [vmem:[#allocation3 + $0x1b8] sm:$0xff]  ;;  %v1155_v24 = vpack.c.bf16 %v180_v21, %v176_v20  ;;  %v184_v26 = vld [vmem:[#allocation3 + $0x190] sm:$0xff]  ;;  %v1633_v43 = vpack.c.bf16 %v73_v41, %v69_v40  ;;  %v78_v47 = vld [vmem:[#allocation5 + $0x48] sm:$0xff] }
  0x4c   :  { %1122 = vmatprep.subr.bf16.mxu1 %v1121_v33  ;;  %v1157_v25 = vpack.c.bf16 %v189_v23, %v185_v22  ;;  %v188_v27 = vld [vmem:[#allocation3 + $0x1b0] sm:$0xff]  ;;  %v193_v28 = vld [vmem:[#allocation3 + $0x1d8] sm:$0xff]  ;;  %v82_v48 = vld [vmem:[#allocation5 + $0x68] sm:$0xff] }
  0x4d   :  { %v197_v29 = vld [vmem:[#allocation3 + $0x1f8] sm:$0xff]  ;;  %v1159_v30 = vpack.c.bf16 %v188_v27, %v184_v26  ;;  %v192_v32 = vld [vmem:[#allocation3 + $0x1d0] sm:$0xff]  ;;  %v77_v52 = vld [vmem:[#allocation5 + $0x40] sm:$0xff] }
  0x4e   :  { %v1161_v31 = vpack.c.bf16 %v197_v29, %v193_v28  ;;  %v196_v33 = vld [vmem:[#allocation3 + $0x1f0] sm:$0xff]  ;;  %v72_v37 = vld [vmem:[#allocation5 + $0x18] sm:$0xff]  ;;  %v81_v53 = vld [vmem:[#allocation5 + $0x60] sm:$0xff] }
  0x4f   :  { %1124 = vmatpush1.bf16.msra.mxu1 %v1123_v38  ;;  %v1163_v34 = vpack.c.bf16 %v196_v33, %v192_v32  ;;  %v1629_v38 = vpack.c.bf16 %v74_v36, %v70_v35  ;;  %v80_v49 = vld [vmem:[#allocation5 + $0x58] sm:$0xff]  ;;  %v1645_v55 = vpack.c.bf16 %v81_v53, %v77_v52  ;;  %v86_v59 = vld [vmem:[#allocation5 + $0x88] sm:$0xff]  ;;  %v89_v2 = vld [vmem:[#allocation5 + $0xa0] sm:$0xff] }
  0x50   :  { %1126 = vmatprep.subr.bf16.mxu1 %v1125_v39  ;;  %v76_v39 = vld [vmem:[#allocation5 + $0x38] sm:$0xff]  ;;  %v90_v60 = vld [vmem:[#allocation5 + $0xa8] sm:$0xff]  ;;  %v87_v5 = vld [vmem:[#allocation5 + $0x90] sm:$0xff] }
  0x51   :  { %v1631_v42 = vpack.c.bf16 %v76_v39, %v72_v37  ;;  %1166 = vmatprep.subr.bf16.mxu0 %v1629_v38  ;;  %v88_v61 = vld [vmem:[#allocation5 + $0x98] sm:$0xff]  ;;  %v1653_v62 = vpack.c.bf16 %v90_v60, %v86_v59  ;;  %v94_v8 = vld [vmem:[#allocation5 + $0xc8] sm:$0xff]  ;;  %v97_v14 = vld [vmem:[#allocation5 + $0xe0] sm:$0xff] }
  0x52   :  { %1168 = vmatpush1.bf16.msra.mxu0 %v1633_v43  ;;  %v98_v9 = vld [vmem:[#allocation5 + $0xe8] sm:$0xff]  ;;  %v96_v10 = vld [vmem:[#allocation5 + $0xd8] sm:$0xff]  ;;  %v95_v17 = vld [vmem:[#allocation5 + $0xd0] sm:$0xff] }
  0x53   :  { %1128 = vmatpush1.bf16.msra.mxu1 %v1127_v44  ;;  %v71_v44 = vld [vmem:[#allocation5 + $0x10] sm:$0xff]  ;;  %v1665_v11 = vpack.c.bf16 %v98_v9, %v94_v8  ;;  %v102_v20 = vld [vmem:[#allocation5 + $0x108] sm:$0xff]  ;;  %v104_v22 = vld [vmem:[#allocation5 + $0x118] sm:$0xff] }
  0x54   :  { %1130 = vmatprep.subr.bf16.mxu1 %v1129_v45  ;;  %v75_v45 = vld [vmem:[#allocation5 + $0x30] sm:$0xff]  ;;  %v106_v21 = vld [vmem:[#allocation5 + $0x128] sm:$0xff]  ;;  %v105_v26 = vld [vmem:[#allocation5 + $0x120] sm:$0xff] }
  0x55   :  { %v1636_v46 = vpack.c.bf16 %v75_v45, %v71_v44  ;;  %v1677_v23 = vpack.c.bf16 %v106_v21, %v102_v20  ;;  %v103_v29 = vld [vmem:[#allocation5 + $0x110] sm:$0xff]  ;;  %v110_v32 = vld [vmem:[#allocation5 + $0x148] sm:$0xff]  ;;  %v116_v36 = vld [vmem:[#allocation5 + $0x178] sm:$0xff]  ;;  %v199_v21 = vlaneseq }
  0x56   :  { %v114_v33 = vld [vmem:[#allocation5 + $0x168] sm:$0xff]  ;;  %v109_v37 = vld [vmem:[#allocation5 + $0x140] sm:$0xff]  ;;  %v111_v44 = vld [vmem:[#allocation5 + $0x150] sm:$0xff] }
  0x57   :  { %1132 = vmatpush1.bf16.msra.mxu1 %v1131_v50  ;;  %v1641_v50 = vpack.c.bf16 %v82_v48, %v78_v47  ;;  %v1689_v35 = vpack.c.bf16 %v114_v33, %v110_v32  ;;  %v113_v39 = vld [vmem:[#allocation5 + $0x160] sm:$0xff]  ;;  %v115_v45 = vld [vmem:[#allocation5 + $0x170] sm:$0xff]  ;;  %v118_v47 = vld [vmem:[#allocation5 + $0x188] sm:$0xff] }
  0x58   :  { %1134 = vmatprep.subr.bf16.mxu1 %v1133_v51  ;;  %v84_v51 = vld [vmem:[#allocation5 + $0x78] sm:$0xff]  ;;  %v1693_v41 = vpack.c.bf16 %v113_v39, %v109_v37  ;;  %v1696_v48 = vpack.c.bf16 %v115_v45, %v111_v44  ;;  %v121_v59 = vld [vmem:[#allocation5 + $0x1a0] sm:$0xff]  ;;  %v119_v60 = vld [vmem:[#allocation5 + $0x190] sm:$0xff] }
  0x59   :  { %v1643_v54 = vpack.c.bf16 %v84_v51, %v80_v49  ;;  %1170 = vmatprep.subr.bf16.mxu0 %v1641_v50  ;;  %v122_v49 = vld [vmem:[#allocation5 + $0x1a8] sm:$0xff]  ;;  %v120_v51 = vld [vmem:[#allocation5 + $0x198] sm:$0xff] }
  0x5a   :  { %284 = vmatmul.mubr.f32.vlgmr.msra.gmra.mrb[0].mxu1 %v133_v56  ;;  %1172 = vmatpush1.bf16.msra.mxu0 %v1645_v55  ;;  %v124_v52 = vld [vmem:[#allocation5 + $0x1b8] sm:$0xff]  ;;  %v1700_v53 = vpack.c.bf16 %v122_v49, %v118_v47 }
  0x5b   :  { %1136 = vmatpush1.bf16.msra.mxu1 %v1135_v57  ;;  %354 = vmatprep.mubr.f32.mxu1 %v1538_v0  ;;  %v83_v57 = vld [vmem:[#allocation5 + $0x70] sm:$0xff]  ;;  %v128_v8 = vld [vmem:[#allocation5 + $0x1d8] sm:$0xff] }
  0x5c   :  { %1138 = vmatprep.subr.bf16.mxu1 %v1137_v58  ;;  %1174 = vmatprep.subr.bf16.mxu0 %v1653_v62  ;;  %v132_v9 = vld [vmem:[#allocation5 + $0x1f8] sm:$0xff] }
  0x5f   :  { %1140 = vmatpush1.bf16.msra.mxu1 %v1139_v63  ;;  %v92_v63 = vld [vmem:[#allocation5 + $0xb8] sm:$0xff] }
  0x60   :  { %1142 = vmatprep.subr.bf16.mxu1 %v1141_v1  ;;  %v85_v1 = vld [vmem:[#allocation5 + $0x80] sm:$0xff]  ;;  %v1655_v3 = vpack.c.bf16 %v92_v63, %v88_v61  ;;  %v123_v63 = vld [vmem:[#allocation5 + $0x1b0] sm:$0xff] }
  0x61   :  { %v1657_v4 = vpack.c.bf16 %v89_v2, %v85_v1  ;;  %v126_v1 = vld [vmem:[#allocation5 + $0x1c8] sm:$0xff] }
  0x62   :  { %v130_v2 = vld [vmem:[#allocation5 + $0x1e8] sm:$0xff] }
  0x63   :  { %1144 = vmatpush1.bf16.msra.mxu1 %v1143_v6  ;;  %v91_v6 = vld [vmem:[#allocation5 + $0xb0] sm:$0xff]  ;;  %1176 = vmatpush1.bf16.msra.mxu0 %v1657_v4 }
  0x64   :  { %1146 = vmatprep.subr.bf16.mxu1 %v1145_v7  ;;  %v1660_v7 = vpack.c.bf16 %v91_v6, %v87_v5  ;;  %1178 = vmatprep.subr.bf16.mxu0 %v1665_v11  ;;  %v1709_v5 = vpack.c.bf16 %v123_v63, %v119_v60  ;;  %v1711_v6 = vpack.c.bf16 %v130_v2, %v126_v1 }
  0x67   :  { %1148 = vmatpush1.bf16.msra.mxu1 %v1147_v12  ;;  %v100_v12 = vld [vmem:[#allocation5 + $0xf8] sm:$0xff] }
  0x68   :  { %1150 = vmatprep.subr.bf16.mxu1 %v1149_v13  ;;  %v93_v13 = vld [vmem:[#allocation5 + $0xc0] sm:$0xff]  ;;  %v1667_v15 = vpack.c.bf16 %v100_v12, %v96_v10  ;;  %v1713_v12 = vpack.c.bf16 %v132_v9, %v128_v8 }
  0x69   :  { %v1669_v16 = vpack.c.bf16 %v97_v14, %v93_v13  ;;  %v125_v10 = vld [vmem:[#allocation5 + $0x1c0] sm:$0xff]  ;;  %v127_v14 = vld [vmem:[#allocation5 + $0x1d0] sm:$0xff] }
  0x6a   :  { %v129_v13 = vld [vmem:[#allocation5 + $0x1e0] sm:$0xff] }
  0x6b   :  { %1152 = vmatpush1.bf16.msra.mxu1 %v1151_v18  ;;  %v99_v18 = vld [vmem:[#allocation5 + $0xf0] sm:$0xff]  ;;  %1180 = vmatpush1.bf16.msra.mxu0 %v1669_v16 }
  0x6c   :  { %1154 = vmatprep.subr.bf16.mxu1 %v1153_v19  ;;  %v1672_v19 = vpack.c.bf16 %v99_v18, %v95_v17  ;;  %1182 = vmatprep.subr.bf16.mxu0 %v1677_v23  ;;  %v131_v17 = vld [vmem:[#allocation5 + $0x1f0] sm:$0xff]  ;;  %v1716_v18 = vpack.c.bf16 %v129_v13, %v125_v10 }
  0x6d   :  { %v1720_v20 = vpack.c.bf16 %v131_v17, %v127_v14 }
  0x6f   :  { %1156 = vmatpush1.bf16.msra.mxu1 %v1155_v24  ;;  %v108_v24 = vld [vmem:[#allocation5 + $0x138] sm:$0xff] }
  0x70   :  { %1158 = vmatprep.subr.bf16.mxu1 %v1157_v25  ;;  %v101_v25 = vld [vmem:[#allocation5 + $0x100] sm:$0xff]  ;;  %v1679_v27 = vpack.c.bf16 %v108_v24, %v104_v22  ;;  %v1727_v22 = vshrl.u32 %v199_v21, 7 }
  0x71   :  { %v1681_v28 = vpack.c.bf16 %v105_v26, %v101_v25  ;;  %v67_v26 = vld [vmem:[%s1881_s3] sm:$0xf] }
  0x72   :  { %v205_v25 = vsub.s32 1, %v1727_v22  ;;  %v209_v44 = vsub.s32 2, %v1727_v22  ;;  %v213_v47 = vsub.s32 3, %v1727_v22 }
  0x73   :  { %1160 = vmatpush1.bf16.msra.mxu1 %v1159_v30  ;;  %v107_v30 = vld [vmem:[#allocation5 + $0x130] sm:$0xff]  ;;  %1184 = vmatpush1.bf16.msra.mxu0 %v1681_v28 }
  0x74   :  { %1162 = vmatprep.subr.bf16.mxu1 %v1161_v31  ;;  %v1684_v31 = vpack.c.bf16 %v107_v30, %v103_v29  ;;  %1186 = vmatprep.subr.bf16.mxu0 %v1689_v35  ;;  %v201_v29 = vsub.s32 0, %v1727_v22  ;;  %v206_v32 = vrot.slane %v67_v26, %v205_v25 }
  0x76   :  { %v202_v33 = vrot.slane %v67_v26, %v201_v29 }
  0x77   :  { %1164 = vmatpush1.bf16.msra.mxu1 %v1163_v34  ;;  %v112_v34 = vld [vmem:[#allocation5 + $0x158] sm:$0xff]  ;;  %1188 = vmatpush1.bf16.msra.mxu0 %v1693_v41 }
  0x78   :  { %1198 = vmatprep.subr.bf16.mxu1 %v1631_v42  ;;  %v1691_v40 = vpack.c.bf16 %v116_v36, %v112_v34  ;;  %1190 = vmatprep.subr.bf16.mxu0 %v1700_v53 }
  0x7a   :  { %355 = vmatmul.mubr.f32.vlgmr.msra.gmra.mrb[2].mxu1 %v133_v56  ;;  %v79_v56 = vld [vmem:[#allocation5 + $0x50] sm:$0xff] }
  0x7b   :  { %542 = vmatprep.mubr.f32.mxu1 %v1538_v0  ;;  %1200 = vmatpush1.bf16.msra.mxu1 %v1636_v46  ;;  %v1648_v58 = vpack.c.bf16 %v83_v57, %v79_v56  ;;  %v1702_v56 = vpack.c.bf16 %v124_v52, %v120_v51  ;;  %v117_v57 = vld [vmem:[#allocation5 + $0x180] sm:$0xff]  ;;  %v210_v52 = vrot.slane %v67_v26, %v209_v44 }
  0x7c   :  { %1202 = vmatprep.subr.bf16.mxu1 %v1643_v54  ;;  %v1705_v61 = vpack.c.bf16 %v121_v59, %v117_v57  ;;  %v214_v59 = vrot.slane %v67_v26, %v213_v47 }
  0x7e   :  { %1192 = vmatpush1.bf16.msra.mxu0 %v1705_v61 }
  0x7f   :  { %1204 = vmatpush1.bf16.msra.mxu1 %v1648_v58  ;;  %1194 = vmatprep.subr.bf16.mxu0 %v1711_v6 }
  0x80   :  { %1206 = vmatprep.subr.bf16.mxu1 %v1655_v3 }
  0x82   :  { %1196 = vmatpush1.bf16.msra.mxu0 %v1716_v18 }
  0x83   :  { %1208 = vmatpush1.bf16.msra.mxu1 %v1660_v7  ;;  %1230 = vmatprep.subr.bf16.mxu0 %v1629_v38 }
  0x84   :  { %1210 = vmatprep.subr.bf16.mxu1 %v1667_v15 }
  0x87   :  { %1212 = vmatpush1.bf16.msra.mxu1 %v1672_v19 }
  0x88   :  { %1214 = vmatprep.subr.bf16.mxu1 %v1679_v27 }
  0x8b   :  { %1216 = vmatpush1.bf16.msra.mxu1 %v1684_v31 }
  0x8c   :  { %1218 = vmatprep.subr.bf16.mxu1 %v1691_v40 }
  0x8f   :  { %1220 = vmatpush1.bf16.msra.mxu1 %v1696_v48 }
  0x90   :  { %1222 = vmatprep.subr.bf16.mxu1 %v1702_v56 }
  0x93   :  { %1224 = vmatpush1.bf16.msra.mxu1 %v1709_v5 }
  0x94   :  { %1226 = vmatprep.subr.bf16.mxu1 %v1713_v12 }
  0x97   :  { %1228 = vmatpush1.bf16.msra.mxu1 %v1720_v20 }
  0x98   :  { %1262 = vmatprep.subr.bf16.mxu1 %v1631_v42 }
 0x12d   :  { %v285_v24 = vpop.f32.mrb[0].mxu1 }
 0x12e   :  { %v287_v30 = vpop.f32.mrb[1].mxu1  ;;  %v286_v36 = vadd.f32 %v285_v24, %v202_v33 }
 0x12f   :  { %v288_v34 = vadd.f32 %v287_v30, %v206_v32 }
 0x130   :  { %v1030_v39 = vmul.f32 -1.442695, %v286_v36 }
 0x131   :  { %v1031_v37 = vmul.f32 -1.442695, %v288_v34  ;;  %v68_v34 = vld [vmem:[%s1882_s4] sm:$0xf] }
 0x132   :  { %v1790_v36 = vrot.slane %v68_v34, %v201_v29 }
 0x133   :  { %1397 = vpow2.f32 %v1031_v37  ;;  %v1794_v37 = vrot.slane %v68_v34, %v205_v25  ;;  %v1805_v25 = vrot.slane %v68_v34, %v209_v44 }
 0x134   :  { %1399 = vpow2.f32 %v1030_v39 }
 0x13d   :  { %v1398_v45 = vpop.eup %1397 }
 0x13e   :  { %v1400_v49 = vpop.eup %1399  ;;  %v370_v51 = vadd.f32 1.0, %v1398_v45 }
 0x13f   :  { %v364_v57 = vadd.f32 1.0, %v1400_v49 }
 0x140   :  { %1401 = vrcp.f32 %v370_v51 }
 0x141   :  { %1403 = vrcp.f32 %v364_v57 }
 0x14a   :  { %v1402_v9 = vpop.eup %1401 }
 0x14b   :  { %v1404_v10 = vpop.eup %1403  ;;  %v380_v14 = vmul.f32 0.0, %v1402_v9 }
 0x14d   :  { %v356_v60 = vpop.f32.mrb[2].mxu1 }
 0x14e   :  { %v357_v63 = vadd.f32 %v356_v60, %v210_v52  ;;  %v358_v1 = vpop.f32.mrb[3].mxu1 }
 0x14f   :  { %v359_v2 = vadd.f32 %v358_v1, %v214_v59  ;;  %v1800_v59 = vrot.slane %v68_v34, %v213_v47  ;;  %v916_v34 = vld [vmem:[#allocation7 + $0x20] sm:$0xff] }
 0x150   :  { %1405 = vtanh.f32 %v357_v63 }
 0x151   :  { %v1032_v8 = vmul.f32 -1.442695, %v359_v2 }
 0x153   :  { %1407 = vpow2.f32 %v1032_v8 }
 0x15a   :  { %v1406_v13 = vpop.eup %1405 }
 0x15b   :  { %v381_v17 = vmul.f32 %v1406_v13, %v1404_v10 }
 0x15d   :  { %v1408_v21 = vpop.eup %1407  ;;  %v1744_v24 = vadd.f32 %v381_v17, %v380_v14 }
 0x15e   :  { %v377_v30 = vadd.f32 1.0, %v1408_v21 }
 0x15f   :  { %1409 = vtanh.f32 %v1744_v24 }
 0x160   :  { %1411 = vrcp.f32 %v377_v30 }
 0x169   :  { %v1410_v26 = vpop.eup %1409 }
 0x16a   :  { %v1412_v32 = vpop.eup %1411 }
 0x16b   :  { %v1747_v33 = vmul.f32 %v1412_v32, %v1410_v26 }
 0x16d   :  { %472 = vmatmul.mubr.f32.vlgmr.msra.gmra.mrb[0].mxu0 %v1747_v33  ;;  %543 = vmatmul.mubr.f32.vlgmr.msra.gmra.mrb[4].mxu1 %v1747_v33 }
 0x16e   :  { %1232 = vmatpush1.bf16.msra.mxu0 %v1633_v43  ;;  %1264 = vmatpush1.bf16.msra.mxu1 %v1636_v46 }
 0x16f   :  { %1234 = vmatprep.subr.bf16.mxu0 %v1641_v50  ;;  %1266 = vmatprep.subr.bf16.mxu1 %v1643_v54 }
 0x170   :  { %638 = vmatprep.mubr.f32.mxu0 %v1538_v0  ;;  %709 = vmatprep.mubr.f32.mxu1 %v1538_v0 }
 0x172   :  { %1236 = vmatpush1.bf16.msra.mxu0 %v1645_v55  ;;  %1268 = vmatpush1.bf16.msra.mxu1 %v1648_v58 }
 0x173   :  { %1238 = vmatprep.subr.bf16.mxu0 %v1653_v62  ;;  %1270 = vmatprep.subr.bf16.mxu1 %v1655_v3 }
 0x176   :  { %1240 = vmatpush1.bf16.msra.mxu0 %v1657_v4  ;;  %1272 = vmatpush1.bf16.msra.mxu1 %v1660_v7 }
 0x177   :  { %1242 = vmatprep.subr.bf16.mxu0 %v1665_v11  ;;  %1274 = vmatprep.subr.bf16.mxu1 %v1667_v15 }
 0x17a   :  { %1244 = vmatpush1.bf16.msra.mxu0 %v1669_v16  ;;  %1276 = vmatpush1.bf16.msra.mxu1 %v1672_v19 }
 0x17b   :  { %1246 = vmatprep.subr.bf16.mxu0 %v1677_v23  ;;  %1278 = vmatprep.subr.bf16.mxu1 %v1679_v27 }
 0x17e   :  { %1248 = vmatpush1.bf16.msra.mxu0 %v1681_v28  ;;  %1280 = vmatpush1.bf16.msra.mxu1 %v1684_v31 }
 0x17f   :  { %1250 = vmatprep.subr.bf16.mxu0 %v1689_v35  ;;  %1282 = vmatprep.subr.bf16.mxu1 %v1691_v40 }
 0x182   :  { %1252 = vmatpush1.bf16.msra.mxu0 %v1693_v41  ;;  %1284 = vmatpush1.bf16.msra.mxu1 %v1696_v48 }
 0x183   :  { %1254 = vmatprep.subr.bf16.mxu0 %v1700_v53  ;;  %1286 = vmatprep.subr.bf16.mxu1 %v1702_v56 }
 0x186   :  { %1256 = vmatpush1.bf16.msra.mxu0 %v1705_v61  ;;  %1288 = vmatpush1.bf16.msra.mxu1 %v1709_v5 }
 0x187   :  { %1258 = vmatprep.subr.bf16.mxu0 %v1711_v6  ;;  %1290 = vmatprep.subr.bf16.mxu1 %v1713_v12 }
 0x18a   :  { %1260 = vmatpush1.bf16.msra.mxu0 %v1716_v18  ;;  %1292 = vmatpush1.bf16.msra.mxu1 %v1720_v20 }
 0x18b   :  { %1294 = vmatprep.subr.bf16.mxu0 %v1629_v38  ;;  %1326 = vmatprep.subr.bf16.mxu1 %v1631_v42 }
 0x240   :  { %v473_v39 = vpop.f32.mrb[0].mxu0  ;;  %v544_v45 = vpop.f32.mrb[4].mxu1 }
 0x241   :  { %v474_v49 = vadd.f32 %v473_v39, %v1790_v36  ;;  %v475_v51 = vpop.f32.mrb[1].mxu0  ;;  %v546_v38 = vpop.f32.mrb[5].mxu1  ;;  %v545_v63 = vadd.f32 %v544_v45, %v1805_v25  ;;  %v917_v39 = vld [vmem:[#allocation7 + $0x28] sm:$0xff] }
 0x242   :  { %v476_v42 = vadd.f32 %v475_v51, %v1794_v37  ;;  %v547_v29 = vadd.f32 %v546_v38, %v1800_v59  ;;  %v1365_v45 = vpack.c.bf16 %v917_v39, %v916_v34  ;;  %v919_v51 = vld [vmem:[#allocation7 + $0x38] sm:$0xff] }
 0x243   :  { %v1033_v52 = vmul.f32 -1.442695, %v474_v49  ;;  %v918_v49 = vld [vmem:[#allocation7 + $0x30] sm:$0xff] }
 0x244   :  { %v1034_v57 = vmul.f32 -1.442695, %v476_v42  ;;  %v1035_v60 = vmul.f32 -1.442695, %v547_v29  ;;  %v1369_v38 = vpack.c.bf16 %v919_v51, %v918_v49  ;;  %v920_v42 = vld [vmem:[#allocation7 + $0x40] sm:$0xff]  ;;  %v922_v29 = vld [vmem:[#allocation7 + $0x50] sm:$0xff] }
 0x245   :  { %1413 = vpow2.f32 %v1033_v52  ;;  %v921_v52 = vld [vmem:[#allocation7 + $0x48] sm:$0xff] }
 0x246   :  { %1415 = vpow2.f32 %v1034_v57  ;;  %v1373_v57 = vpack.c.bf16 %v921_v52, %v920_v42 }
 0x247   :  { %1417 = vpow2.f32 %v1035_v60  ;;  %v923_v60 = vld [vmem:[#allocation7 + $0x58] sm:$0xff] }
 0x248   :  { %1419 = vtanh.f32 %v545_v63  ;;  %v1377_v63 = vpack.c.bf16 %v923_v60, %v922_v29 }
 0x24f   :  { %v1414_v1 = vpop.eup %1413 }
 0x250   :  { %v1416_v2 = vpop.eup %1415  ;;  %v552_v8 = vadd.f32 1.0, %v1414_v1  ;;  %v924_v1 = vld [vmem:[#allocation7 + $0x60] sm:$0xff] }
 0x251   :  { %v558_v9 = vadd.f32 1.0, %v1416_v2  ;;  %v1418_v47 = vpop.eup %1417  ;;  %v925_v2 = vld [vmem:[#allocation7 + $0x68] sm:$0xff] }
 0x252   :  { %1421 = vrcp.f32 %v552_v8  ;;  %v1420_v10 = vpop.eup %1419  ;;  %v565_v21 = vadd.f32 1.0, %v1418_v47  ;;  %v926_v8 = vld [vmem:[#allocation7 + $0x70] sm:$0xff] }
 0x253   :  { %1423 = vrcp.f32 %v558_v9  ;;  %v927_v9 = vld [vmem:[#allocation7 + $0x78] sm:$0xff] }
 0x254   :  { %1425 = vrcp.f32 %v565_v21  ;;  %v1385_v47 = vpack.c.bf16 %v927_v9, %v926_v8 }
 0x25c   :  { %v1422_v13 = vpop.eup %1421 }
 0x25d   :  { %v1424_v14 = vpop.eup %1423  ;;  %v569_v17 = vmul.f32 %v1422_v13, %v1420_v10 }
 0x25e   :  { %v568_v22 = vmul.f32 %v1424_v14, %v1744_v24  ;;  %v1426_v30 = vpop.eup %1425 }
 0x260   :  { %v1809_v44 = vadd.f32 %v569_v17, %v568_v22 }
 0x262   :  { %1427 = vtanh.f32 %v1809_v44 }
 0x26c   :  { %v1428_v26 = vpop.eup %1427 }
 0x26d   :  { %v1812_v32 = vmul.f32 %v1428_v26, %v1426_v30 }
 0x26f   :  { %639 = vmatmul.mubr.f32.vlgmr.msra.gmra.mrb[2].mxu0 %v1812_v32  ;;  %710 = vmatmul.mubr.f32.vlgmr.msra.gmra.mrb[6].mxu1 %v1812_v32 }
 0x270   :  { %1296 = vmatpush1.bf16.msra.mxu0 %v1633_v43  ;;  %1328 = vmatpush1.bf16.msra.mxu1 %v1636_v46  ;;  %v913_v43 = vld [vmem:[#allocation7 + $0x8] sm:$0xff] }
 0x271   :  { %1298 = vmatprep.subr.bf16.mxu0 %v1641_v50  ;;  %1330 = vmatprep.subr.bf16.mxu1 %v1643_v54 }
 0x272   :  { %805 = vmatprep.mubr.f32.mxu0 %v1538_v0  ;;  %876 = vmatprep.mubr.f32.mxu1 %v1538_v0  ;;  %v912_v0 = vld [vmem:[#allocation7] sm:$0xff] }
 0x273   :  { %v1357_v46 = vpack.c.bf16 %v913_v43, %v912_v0 }
 0x274   :  { %1300 = vmatpush1.bf16.msra.mxu0 %v1645_v55  ;;  %1332 = vmatpush1.bf16.msra.mxu1 %v1648_v58 }
 0x275   :  { %1302 = vmatprep.subr.bf16.mxu0 %v1653_v62  ;;  %1334 = vmatprep.subr.bf16.mxu1 %v1655_v3 }
 0x278   :  { %1304 = vmatpush1.bf16.msra.mxu0 %v1657_v4  ;;  %1336 = vmatpush1.bf16.msra.mxu1 %v1660_v7 }
 0x279   :  { %1306 = vmatprep.subr.bf16.mxu0 %v1665_v11  ;;  %1338 = vmatprep.subr.bf16.mxu1 %v1667_v15 }
 0x27c   :  { %1308 = vmatpush1.bf16.msra.mxu0 %v1669_v16  ;;  %1340 = vmatpush1.bf16.msra.mxu1 %v1672_v19 }
 0x27d   :  { %1310 = vmatprep.subr.bf16.mxu0 %v1677_v23  ;;  %1342 = vmatprep.subr.bf16.mxu1 %v1679_v27 }
 0x280   :  { %1312 = vmatpush1.bf16.msra.mxu0 %v1681_v28  ;;  %1344 = vmatpush1.bf16.msra.mxu1 %v1684_v31 }
 0x281   :  { %1314 = vmatprep.subr.bf16.mxu0 %v1689_v35  ;;  %1346 = vmatprep.subr.bf16.mxu1 %v1691_v40 }
 0x284   :  { %1316 = vmatpush1.bf16.msra.mxu0 %v1693_v41  ;;  %1348 = vmatpush1.bf16.msra.mxu1 %v1696_v48 }
 0x285   :  { %1318 = vmatprep.subr.bf16.mxu0 %v1700_v53  ;;  %1350 = vmatprep.subr.bf16.mxu1 %v1702_v56 }
 0x288   :  { %1320 = vmatpush1.bf16.msra.mxu0 %v1705_v61  ;;  %1352 = vmatpush1.bf16.msra.mxu1 %v1709_v5  ;;  %v914_v5 = vld [vmem:[#allocation7 + $0x10] sm:$0xff] }
 0x289   :  { %1322 = vmatprep.subr.bf16.mxu0 %v1711_v6  ;;  %1354 = vmatprep.subr.bf16.mxu1 %v1713_v12  ;;  %v915_v6 = vld [vmem:[#allocation7 + $0x18] sm:$0xff] }
 0x28a   :  { %v1361_v24 = vpack.c.bf16 %v915_v6, %v914_v5 }
 0x28c   :  { %1324 = vmatpush1.bf16.msra.mxu0 %v1716_v18  ;;  %1356 = vmatpush1.bf16.msra.mxu1 %v1720_v20 }
 0x28d   :  { %1358 = vmatprep.subr.bf16.mxu0 %v1357_v46 }
 0x342   :  { %v640_v50 = vpop.f32.mrb[2].mxu0  ;;  %v711_v54 = vpop.f32.mrb[6].mxu1 }
 0x343   :  { %v641_v55 = vadd.f32 %v640_v50, %v1790_v36  ;;  %v642_v58 = vpop.f32.mrb[3].mxu0  ;;  %v713_v62 = vpop.f32.mrb[7].mxu1  ;;  %v712_v16 = vadd.f32 %v711_v54, %v1805_v25 }
 0x344   :  { %v643_v3 = vadd.f32 %v642_v58, %v1794_v37  ;;  %v714_v11 = vadd.f32 %v713_v62, %v1800_v59 }
 0x345   :  { %v1036_v4 = vmul.f32 -1.442695, %v641_v55 }
 0x346   :  { %v1037_v7 = vmul.f32 -1.442695, %v643_v3  ;;  %v1038_v15 = vmul.f32 -1.442695, %v714_v11 }
 0x347   :  { %1429 = vpow2.f32 %v1036_v4 }
 0x348   :  { %1431 = vpow2.f32 %v1037_v7 }
 0x349   :  { %1433 = vpow2.f32 %v1038_v15 }
 0x34a   :  { %1435 = vtanh.f32 %v712_v16 }
 0x351   :  { %v1430_v19 = vpop.eup %1429 }
 0x352   :  { %v1432_v23 = vpop.eup %1431  ;;  %v719_v27 = vadd.f32 1.0, %v1430_v19 }
 0x353   :  { %v725_v28 = vadd.f32 1.0, %v1432_v23  ;;  %v1434_v31 = vpop.eup %1433 }
 0x354   :  { %1437 = vrcp.f32 %v719_v27  ;;  %v1436_v35 = vpop.eup %1435  ;;  %v732_v53 = vadd.f32 1.0, %v1434_v31 }
 0x355   :  { %1439 = vrcp.f32 %v725_v28 }
 0x356   :  { %1441 = vrcp.f32 %v732_v53 }
 0x35e   :  { %v1438_v40 = vpop.eup %1437 }
 0x35f   :  { %v1440_v41 = vpop.eup %1439  ;;  %v736_v48 = vmul.f32 %v1438_v40, %v1436_v35 }
 0x360   :  { %v735_v56 = vmul.f32 %v1440_v41, %v1809_v44  ;;  %v1442_v12 = vpop.eup %1441 }
 0x362   :  { %v1853_v61 = vadd.f32 %v736_v48, %v735_v56 }
 0x364   :  { %1443 = vtanh.f32 %v1853_v61 }
 0x36e   :  { %v1444_v18 = vpop.eup %1443 }
 0x36f   :  { %v739_v20 = vmul.f32 %v1444_v18, %v1442_v12 }
 0x371   :  { %806 = vmatmul.mubr.f32.vlgmr.msra.gmra.mrb[4].mxu0 %v739_v20  ;;  %877 = vmatmul.mubr.f32.vlgmr.msra.gmra.mrb[8].mxu1 %v739_v20 }
 0x372   :  { %1360 = vmatpush3.bf16.msra.mxu0 %v1357_v46  ;;  %1095 = vmatprep.mubr.f32.mxu0 %v1747_v33  ;;  %v1381_v33 = vpack.c.bf16 %v925_v2, %v924_v1 }
 0x373   :  { %1362 = vmatprep.subr.bf16.mxu0 %v1361_v24 }
 0x376   :  { %1364 = vmatpush3.bf16.msra.mxu0 %v1361_v24 }
 0x377   :  { %1366 = vmatprep.subr.bf16.mxu0 %v1365_v45 }
 0x37a   :  { %1368 = vmatpush3.bf16.msra.mxu0 %v1365_v45 }
 0x37b   :  { %1370 = vmatprep.subr.bf16.mxu0 %v1369_v38 }
 0x37e   :  { %1372 = vmatpush3.bf16.msra.mxu0 %v1369_v38 }
 0x37f   :  { %1374 = vmatprep.subr.bf16.mxu0 %v1373_v57 }
 0x382   :  { %1376 = vmatpush3.bf16.msra.mxu0 %v1373_v57 }
 0x383   :  { %1378 = vmatprep.subr.bf16.mxu0 %v1377_v63 }
 0x386   :  { %1380 = vmatpush3.bf16.msra.mxu0 %v1377_v63 }
 0x387   :  { %1382 = vmatprep.subr.bf16.mxu0 %v1381_v33 }
 0x38a   :  { %1384 = vmatpush3.bf16.msra.mxu0 %v1381_v33 }
 0x38b   :  { %1386 = vmatprep.subr.bf16.mxu0 %v1385_v47 }
 0x38e   :  { %1388 = vmatpush3.bf16.msra.mxu0 %v1385_v47 }
 0x391   :  { %1096 = vmatmul.mubr.f32.vlgmr.msra.gmra.mrb[6].mxu0 %v1812_v32 }
 0x392   :  { %1098 = vmatprep.mubr.f32.mxu0 %v739_v20 }
 0x444   :  { %v807_v10 = vpop.f32.mrb[4].mxu0  ;;  %v878_v13 = vpop.f32.mrb[8].mxu1 }
 0x445   :  { %v808_v14 = vadd.f32 %v807_v10, %v1790_v36  ;;  %v809_v17 = vpop.f32.mrb[5].mxu0  ;;  %v880_v21 = vpop.f32.mrb[9].mxu1  ;;  %v879_v43 = vadd.f32 %v878_v13, %v1805_v25 }
 0x446   :  { %v810_v22 = vadd.f32 %v809_v17, %v1794_v37  ;;  %v881_v26 = vadd.f32 %v880_v21, %v1800_v59  ;;  %v1042_v59 = vld [vmem:[%s1884_s6] ss:$0 sm:$0xff] }
 0x447   :  { %v1039_v44 = vmul.f32 -1.442695, %v808_v14 }
 0x448   :  { %v1040_v30 = vmul.f32 -1.442695, %v810_v22  ;;  %v1041_v0 = vmul.f32 -1.442695, %v881_v26 }
 0x449   :  { %1445 = vpow2.f32 %v1039_v44 }
 0x44a   :  { %1447 = vpow2.f32 %v1040_v30 }
 0x44b   :  { %1449 = vpow2.f32 %v1041_v0 }
 0x44c   :  { %1451 = vtanh.f32 %v879_v43 }
 0x453   :  { %v1446_v46 = vpop.eup %1445 }
 0x454   :  { %v1448_v32 = vpop.eup %1447  ;;  %v886_v50 = vadd.f32 1.0, %v1446_v46 }
 0x455   :  { %v892_v54 = vadd.f32 1.0, %v1448_v32  ;;  %v1450_v36 = vpop.eup %1449 }
 0x456   :  { %1453 = vrcp.f32 %v886_v50  ;;  %v1452_v55 = vpop.eup %1451  ;;  %v899_v3 = vadd.f32 1.0, %v1450_v36 }
 0x457   :  { %1455 = vrcp.f32 %v892_v54 }
 0x458   :  { %1457 = vrcp.f32 %v899_v3 }
 0x460   :  { %v1454_v37 = vpop.eup %1453 }
 0x461   :  { %v1456_v58 = vpop.eup %1455  ;;  %v903_v62 = vmul.f32 %v1454_v37, %v1452_v55 }
 0x462   :  { %v902_v4 = vmul.f32 %v1456_v58, %v1853_v61  ;;  %v1458_v19 = vpop.eup %1457 }
 0x464   :  { %v1097_v25 = vpop.f32.mrb[6].mxu0  ;;  %v904_v7 = vadd.f32 %v903_v62, %v902_v4 }
 0x465   :  { %v1007_v11 = vadd.f32 %v1097_v25, %v1042_v59  ;;  %v1001_v15 = vpop.f32.mrb[7].mxu0 }
 0x466   :  { %v1002_v16 = vadd.f32 %v1042_v59, %v1001_v15  ;;  %1459 = vtanh.f32 %v904_v7 }
 0x467   :  { %1021 = vst [vmem:[%s1885_s7 + $0x8] sm:$0xff] %v1007_v11 }
 0x468   :  { %1020 = vst [vmem:[%s1885_s7] sm:$0xff] %v1002_v16 }
 0x470   :  { %v1460_v23 = vpop.eup %1459 }
 0x471   :  { %v906_v27 = vmul.f32 %v1460_v23, %v1458_v19 }
 0x473   :  { %1099 = vmatmul.mubr.f32.gmra.mrb[8].mxu0 %v906_v27 }
 0x546   :  { %v1100_v28 = vpop.f32.mrb[8].mxu0 }
 0x547   :  { %v1017_v31 = vadd.f32 %v1100_v28, %v1042_v59  ;;  %v1011_v35 = vpop.f32.mrb[9].mxu0 }
 0x548   :  { %v1012_v40 = vadd.f32 %v1042_v59, %v1011_v35 }
 0x549   :  { %1023 = vst [vmem:[%s1885_s7 + $0x18] sm:$0xff] %v1017_v31 }
 0x54a   :  { %1022 = vst [vmem:[%s1885_s7 + $0x10] sm:$0xff] %v1012_v40 }
 0x54b   :  { %1028 = vsyncpa [#allocation4], 1 }
 0x54c   :  { %1029 = vsyncpa [#allocation6], 1 }

</bundles_post_ra>
